<compile_context>
chip_gen: v5e
topology: v5e:2x2
jax: 0.10.0
libtpu: 0.0.40
codegen_flags: <defaults>
</compile_context>

<pallas_src>
import jax
import jax.numpy as jnp
import numpy as np
from jax import lax
from jax.experimental import pallas as pl
from jax.experimental.pallas import tpu as pltpu

_NORM_EPS = 1e-12          # torch.nn.functional.normalize eps (clamps the norm)
_LANE = 128                # TPU lane width
_MAX_ROWS_PER_TILE = 4096  # 4096 x 128 pixels / step: ~10 MiB/step, 20 MiB double-buffered
_CAM_STRIDE = 16           # scalars per camera in the SMEM parameter table (9 used, padded)


def _cdiv(a, b):
    return -(-a // b)


def _round_up(a, m):
    return _cdiv(a, m) * m


def _ray_dir_kernel(cam_ref, uv_ref, dir_ref):
    # cam_ref: (SV*16,) f32 in SMEM: per camera [A0,B0,C0, A1,B1,C1, A2,B2,C2, pad...]
    #   with A_i = E[i,0]/fx, B_i = E[i,1]/fy, C_i = E[i,2] - A_i*cx - B_i*cy, so that
    #   d_i = A_i*u + B_i*v + C_i  ==  E[i,:3] @ [(u-cx)/fx, (v-cy)/fy, 1]
    #   (the E[i,3]*1 - translation_i terms cancel exactly).
    # uv_ref:  (1, 2, tr, 128) pixel coordinates (u slab, v slab)
    # dir_ref: (1, 3, tr, 128) normalized ray directions (output)
    base = pl.program_id(0) * _CAM_STRIDE

    u = uv_ref[0, 0]                       # (tr, 128)
    v = uv_ref[0, 1]                       # (tr, 128)

    d0 = cam_ref[base + 0] * u + cam_ref[base + 1] * v + cam_ref[base + 2]
    d1 = cam_ref[base + 3] * u + cam_ref[base + 4] * v + cam_ref[base + 5]
    d2 = cam_ref[base + 6] * u + cam_ref[base + 7] * v + cam_ref[base + 8]

    # F.normalize(d, p=2, dim=0): clamp on squared norm (eps^2), rsqrt on the EUP.
    # The clamp also keeps padded lanes finite.
    sumsq = d0 * d0 + d1 * d1 + d2 * d2
    inv_norm = lax.rsqrt(jnp.maximum(sumsq, _NORM_EPS * _NORM_EPS))

    dir_ref[0, 0] = d0 * inv_norm
    dir_ref[0, 1] = d1 * inv_norm
    dir_ref[0, 2] = d2 * inv_norm


def _pick_row_tiling(rows, sv):
    """Pick (tile_rows, padded_rows, num_tiles) for the (rows, 128) pixel slab."""
    if rows <= _MAX_ROWS_PER_TILE:
        if sv == 1 and rows >= 16:
            n_tiles = 2      # keep both v7x TensorCores busy even with one camera
        else:
            return rows, rows, 1   # single full-dim tile (no /8 constraint)
    else:
        n_tiles = _cdiv(rows, _MAX_ROWS_PER_TILE)
    tr = _round_up(_cdiv(rows, n_tiles), 8)   # minimal padding, sublane-aligned
    return tr, n_tiles * tr, n_tiles


def _ray_dirs_pallas(flatten_uv, cam_params):
    """flatten_uv: (SV, 2, N) f32, cam_params: (SV*16,) f32 -> (SV, 3, N) f32."""
    SV, _, N = flatten_uv.shape

    rows = _cdiv(N, _LANE)
    tr, rows_p, num_tiles = _pick_row_tiling(rows, SV)

    n_pad = rows_p * _LANE - N
    if n_pad:
        # Only the ragged tail is padded (kept minimal by the tiling above);
        # padded lanes compute harmless finite values and are sliced off below.
        flatten_uv = jnp.pad(flatten_uv, ((0, 0), (0, 0), (0, n_pad)))
    uv4 = flatten_uv.reshape(SV, 2, rows_p, _LANE)

    out = pl.pallas_call(
        _ray_dir_kernel,
        out_shape=jax.ShapeDtypeStruct((SV, 3, rows_p, _LANE), jnp.float32),
        grid=(SV, num_tiles),
        in_specs=[
            # Tiny per-camera scalar table: lives in SMEM, read as scalars + splat.
            pl.BlockSpec(memory_space=pltpu.MemorySpace.SMEM),
            # Dense (tr, 128) pixel slabs, pipelined over (camera, pixel-tile).
            pl.BlockSpec((1, 2, tr, _LANE), lambda b, t: (b, 0, t, 0)),
            # TODO(synk): on v7x, pipeline_mode=pl.Buffered(3) on the uv spec is a
            # modest further win; left at the default double buffer for portability.
        ],
        out_specs=pl.BlockSpec((1, 3, tr, _LANE), lambda b, t: (b, 0, t, 0)),
        compiler_params=pltpu.CompilerParams(
            dimension_semantics=("parallel", "parallel"),
            vmem_limit_bytes=32 * 1024 * 1024),
    )(cam_params, uv4)

    out = out.reshape(SV, 3, rows_p * _LANE)
    return out if n_pad == 0 else out[:, :, :N]


class ImageReader:
    """JAX/Pallas port of fairnr ImageReader (eval / no_sampling_at_reader path).

    ray_dir_channel_first=False (default) returns ray_dir as (S, V, N, 3), matching the
    PyTorch module's `ray_dir.transpose(2, 3)`. Setting it True returns the kernel's
    native channel-first (S, V, 3, N) layout and skips a full extra HBM transpose pass
    (recommended when the downstream consumer can read channel-first).
    """

    def __init__(self, pixel_per_view=64, no_sampling_at_reader=True,
                 ray_dir_channel_first=False):
        self.num_pixels = pixel_per_view
        self.no_sampling = no_sampling_at_reader
        self.ray_dir_channel_first = ray_dir_channel_first
        self.deltas = None  # TODO(synk): trainable-extrinsics deltas are keyed by dataset file paths; not representable here.

    def __call__(self, uv, intrinsics, extrinsics, size=None, **kwargs):
        # TODO(synk): training-time sample_pixels (Gumbel top-k + boolean-mask gather)
        # produces data-dependent shapes; only the eval/no_sampling path is implemented.
        S, V = uv.shape[:2]
        N = int(np.prod(uv.shape[3:])) if uv.ndim > 3 else uv.shape[-1]
        uv = uv.reshape(S, V, 2, N)
        SV = S * V

        uv_out = uv.reshape(S, V, 2, N, 1, 1)
        flatten_uv = uv.reshape(SV, 2, N).astype(jnp.float32)

        if intrinsics.ndim == 3:  # (S, 4, 4) shared across views
            intr = jnp.broadcast_to(intrinsics[:, None], (S, V, 4, 4))
        else:                     # (S, V, 4, 4)
            intr = intrinsics
        intr = intr.reshape(SV, 4, 4).astype(jnp.float32)
        ext = extrinsics.reshape(SV, 4, 4).astype(jnp.float32)

        # Fold the intrinsics into the rotation: 9 scalars per camera (SMEM table).
        inv_fx = 1.0 / intr[:, 0, 0]
        inv_fy = 1.0 / intr[:, 1, 1]
        cx, cy = intr[:, 0, 2], intr[:, 1, 2]
        A = ext[:, :3, 0] * inv_fx[:, None]                              # (SV, 3)
        B = ext[:, :3, 1] * inv_fy[:, None]                              # (SV, 3)
        C = ext[:, :3, 2] - A * cx[:, None] - B * cy[:, None]            # (SV, 3)
        cam = jnp.stack([A[:, 0], B[:, 0], C[:, 0],
                         A[:, 1], B[:, 1], C[:, 1],
                         A[:, 2], B[:, 2], C[:, 2]], axis=-1)            # (SV, 9)
        cam = jnp.pad(cam, ((0, 0), (0, _CAM_STRIDE - cam.shape[-1])))   # (SV, 16)
        cam_flat = cam.reshape(-1)                                       # (SV*16,)

        ray_dir = _ray_dirs_pallas(flatten_uv, cam_flat).reshape(S, V, 3, N)
        if not self.ray_dir_channel_first:
            # Torch-compatible (S, V, N, 3). NOTE: this is an extra full-HBM pass;
            # prefer ray_dir_channel_first=True when the consumer accepts (S, V, 3, N).
            ray_dir = ray_dir.transpose(0, 1, 3, 2)

        ray_start = extrinsics[..., :3, 3].reshape(S, V, 1, 3)           # (S, V, 1, 3)
        return ray_start, ray_dir, uv_out


def _reference_forward(uv, intrinsics, extrinsics):
    """Pure-jnp reference of the same math (channel-last (S,V,N,3) like PyTorch)."""
    S, V = uv.shape[:2]
    if intrinsics.ndim == 3:
        intr = jnp.broadcast_to(intrinsics[:, None], (S, V, 4, 4))
    else:
        intr = intrinsics
    fx = intr[..., 0, 0][..., None]
    fy = intr[..., 1, 1][..., None]
    cx = intr[..., 0, 2][..., None]
    cy = intr[..., 1, 2][..., None]
    u = uv[:, :, 0, :]
    v = uv[:, :, 1, :]
    x = (u - cx) / fx
    y = (v - cy) / fy
    ones = jnp.ones_like(x)
    cam = jnp.stack([x, y, ones, ones], axis=2)                       # (S,V,4,N)
    world = jnp.einsum("svij,svjn->svin", extrinsics, cam)[:, :, :3]  # (S,V,3,N)
    t = extrinsics[:, :, :3, 3][..., None]
    d = world - t
    norm = jnp.maximum(jnp.linalg.norm(d, axis=2, keepdims=True), _NORM_EPS)
    return (d / norm).transpose(0, 1, 3, 2)                           # (S,V,N,3)


if __name__ == "__main__":
    key = jax.random.PRNGKey(0)
    S, V, H, W = 2, 2, 16, 16
    N = H * W  # 256 pixels per view

    # Pixel-grid uv coordinates, channel-first like the PyTorch dataloader.
    ys, xs = jnp.meshgrid(jnp.arange(H, dtype=jnp.float32),
                          jnp.arange(W, dtype=jnp.float32), indexing="ij")
    uv_single = jnp.stack([xs.reshape(-1), ys.reshape(-1)], axis=0)   # (2, N)
    uv = jnp.broadcast_to(uv_single, (S, V, 2, N))

    # Intrinsics: shared per scene, shape (S, 4, 4).
    Kmat = jnp.array([[20.0, 0.0, 8.0, 0.0],
                      [0.0, 20.0, 8.0, 0.0],
                      [0.0, 0.0, 1.0, 0.0],
                      [0.0, 0.0, 0.0, 1.0]], dtype=jnp.float32)
    intrinsics = jnp.broadcast_to(Kmat, (S, 4, 4))

    # Extrinsics: deterministic pseudo-random 3x4 upper block, last row [0,0,0,1].
    k1, k2 = jax.random.split(key)
    rot = jax.random.normal(k1, (S, V, 3, 3), dtype=jnp.float32)
    trans = jax.random.normal(k2, (S, V, 3, 1), dtype=jnp.float32) * 2.0
    top = jnp.concatenate([rot, trans], axis=-1)                      # (S,V,3,4)
    bottom = jnp.broadcast_to(jnp.array([[0.0, 0.0, 0.0, 1.0]], jnp.float32),
                              (S, V, 1, 4))
    extrinsics = jnp.concatenate([top, bottom], axis=2)               # (S,V,4,4)
    size = jnp.broadcast_to(jnp.array([[H, W, 1.0, 1.0]], jnp.float32), (S, V, 4))

    # Default path: torch-compatible (S, V, N, 3) ray_dir.
    reader = ImageReader(pixel_per_view=64, no_sampling_at_reader=True)
    ray_start, ray_dir, uv_out = reader(uv, intrinsics, extrinsics, size=size)
    jax.block_until_ready((ray_start, ray_dir, uv_out))

    assert ray_start.shape == (S, V, 1, 3)
    assert ray_dir.shape == (S, V, N, 3)
    assert uv_out.shape == (S, V, 2, N, 1, 1)

    ref_dir = _reference_forward(uv, intrinsics, extrinsics)
    np.testing.assert_allclose(np.asarray(ray_dir), np.asarray(ref_dir),
                               rtol=1e-5, atol=1e-5)
    ref_start = extrinsics[:, :, :3, 3][:, :, None, :]
    np.testing.assert_allclose(np.asarray(ray_start), np.asarray(ref_start),
                               rtol=1e-6, atol=1e-6)

    # Fast path: channel-first (S, V, 3, N) ray_dir (no wrapper transpose pass).
    reader_cf = ImageReader(pixel_per_view=64, no_sampling_at_reader=True,
                            ray_dir_channel_first=True)
    _, ray_dir_cf, _ = reader_cf(uv, intrinsics, extrinsics, size=size)
    jax.block_until_ready(ray_dir_cf)
    assert ray_dir_cf.shape == (S, V, 3, N)
    np.testing.assert_allclose(np.asarray(ray_dir_cf),
                               np.asarray(ref_dir).transpose(0, 1, 3, 2),
                               rtol=1e-5, atol=1e-5)

    print("KERNEL_OK")
</pallas_src>

<mosaic_0001>
module attributes {stable_mosaic.version = 11 : i64} {
  func.func @_ray_dir_kernel(%arg0: i32, %arg1: i32, %arg2: memref<64xf32, #tpu.memory_space<smem>>, %arg3: memref<1x2x2x128xf32, #tpu.memory_space<vmem>>, %arg4: memref<1x3x2x128xf32, #tpu.memory_space<vmem>>) attributes {dimension_semantics = [#tpu.dimension_semantics<parallel>, #tpu.dimension_semantics<parallel>], iteration_bounds = array<i64: 4, 1>, scalar_prefetch = 0 : i64, scratch_operands = 0 : i64, tpu.core_type = #tpu.core_type<tc>, window_params = [{transform_indices = @transform_0, window_bounds = array<i64: 64>}, {transform_indices = @transform_1, window_bounds = array<i64: 1, 2, 2, 128>}, {transform_indices = @transform_2, window_bounds = array<i64: 1, 3, 2, 128>}]} {
    %c16_i32 = arith.constant 16 : i32
    %0 = arith.muli %arg0, %c16_i32 : i32
    %c0 = arith.constant 0 : index
    %c0_0 = arith.constant 0 : index
    %c0_1 = arith.constant 0 : index
    %c0_2 = arith.constant 0 : index
    %1 = vector.load %arg3[%c0, %c0_0, %c0_1, %c0_2] : memref<1x2x2x128xf32, #tpu.memory_space<vmem>>, vector<1x1x2x128xf32>
    %2 = vector.shape_cast %1 : vector<1x1x2x128xf32> to vector<2x128xf32>
    %c0_3 = arith.constant 0 : index
    %c1 = arith.constant 1 : index
    %c0_4 = arith.constant 0 : index
    %c0_5 = arith.constant 0 : index
    %3 = vector.load %arg3[%c0_3, %c1, %c0_4, %c0_5] : memref<1x2x2x128xf32, #tpu.memory_space<vmem>>, vector<1x1x2x128xf32>
    %4 = vector.shape_cast %3 : vector<1x1x2x128xf32> to vector<2x128xf32>
    %c0_i32 = arith.constant 0 : i32
    %5 = arith.addi %0, %c0_i32 : i32
    %6 = arith.index_cast %5 : i32 to index
    %7 = memref.load %arg2[%6] : memref<64xf32, #tpu.memory_space<smem>>
    %8 = vector.broadcast %7 : f32 to vector<2x128xf32>
    %9 = arith.mulf %8, %2 : vector<2x128xf32>
    %c1_i32 = arith.constant 1 : i32
    %10 = arith.addi %0, %c1_i32 : i32
    %11 = arith.index_cast %10 : i32 to index
    %12 = memref.load %arg2[%11] : memref<64xf32, #tpu.memory_space<smem>>
    %13 = vector.broadcast %12 : f32 to vector<2x128xf32>
    %14 = arith.mulf %13, %4 : vector<2x128xf32>
    %15 = arith.addf %9, %14 : vector<2x128xf32>
    %c2_i32 = arith.constant 2 : i32
    %16 = arith.addi %0, %c2_i32 : i32
    %17 = arith.index_cast %16 : i32 to index
    %18 = memref.load %arg2[%17] : memref<64xf32, #tpu.memory_space<smem>>
    %19 = vector.broadcast %18 : f32 to vector<2x128xf32>
    %20 = arith.addf %15, %19 : vector<2x128xf32>
    %c3_i32 = arith.constant 3 : i32
    %21 = arith.addi %0, %c3_i32 : i32
    %22 = arith.index_cast %21 : i32 to index
    %23 = memref.load %arg2[%22] : memref<64xf32, #tpu.memory_space<smem>>
    %24 = vector.broadcast %23 : f32 to vector<2x128xf32>
    %25 = arith.mulf %24, %2 : vector<2x128xf32>
    %c4_i32 = arith.constant 4 : i32
    %26 = arith.addi %0, %c4_i32 : i32
    %27 = arith.index_cast %26 : i32 to index
    %28 = memref.load %arg2[%27] : memref<64xf32, #tpu.memory_space<smem>>
    %29 = vector.broadcast %28 : f32 to vector<2x128xf32>
    %30 = arith.mulf %29, %4 : vector<2x128xf32>
    %31 = arith.addf %25, %30 : vector<2x128xf32>
    %c5_i32 = arith.constant 5 : i32
    %32 = arith.addi %0, %c5_i32 : i32
    %33 = arith.index_cast %32 : i32 to index
    %34 = memref.load %arg2[%33] : memref<64xf32, #tpu.memory_space<smem>>
    %35 = vector.broadcast %34 : f32 to vector<2x128xf32>
    %36 = arith.addf %31, %35 : vector<2x128xf32>
    %c6_i32 = arith.constant 6 : i32
    %37 = arith.addi %0, %c6_i32 : i32
    %38 = arith.index_cast %37 : i32 to index
    %39 = memref.load %arg2[%38] : memref<64xf32, #tpu.memory_space<smem>>
    %40 = vector.broadcast %39 : f32 to vector<2x128xf32>
    %41 = arith.mulf %40, %2 : vector<2x128xf32>
    %c7_i32 = arith.constant 7 : i32
    %42 = arith.addi %0, %c7_i32 : i32
    %43 = arith.index_cast %42 : i32 to index
    %44 = memref.load %arg2[%43] : memref<64xf32, #tpu.memory_space<smem>>
    %45 = vector.broadcast %44 : f32 to vector<2x128xf32>
    %46 = arith.mulf %45, %4 : vector<2x128xf32>
    %47 = arith.addf %41, %46 : vector<2x128xf32>
    %c8_i32 = arith.constant 8 : i32
    %48 = arith.addi %0, %c8_i32 : i32
    %49 = arith.index_cast %48 : i32 to index
    %50 = memref.load %arg2[%49] : memref<64xf32, #tpu.memory_space<smem>>
    %51 = vector.broadcast %50 : f32 to vector<2x128xf32>
    %52 = arith.addf %47, %51 : vector<2x128xf32>
    %53 = arith.mulf %20, %20 : vector<2x128xf32>
    %54 = arith.mulf %36, %36 : vector<2x128xf32>
    %55 = arith.addf %53, %54 : vector<2x128xf32>
    %56 = arith.mulf %52, %52 : vector<2x128xf32>
    %57 = arith.addf %55, %56 : vector<2x128xf32>
    %cst = arith.constant 1.000000e-24 : f32
    %58 = vector.broadcast %cst : f32 to vector<2x128xf32>
    %59 = arith.maximumf %57, %58 : vector<2x128xf32>
    %60 = math.rsqrt %59 : vector<2x128xf32>
    %61 = arith.mulf %20, %60 : vector<2x128xf32>
    %c0_6 = arith.constant 0 : index
    %c0_7 = arith.constant 0 : index
    %c0_8 = arith.constant 0 : index
    %c0_9 = arith.constant 0 : index
    %62 = vector.load %arg4[%c0_6, %c0_7, %c0_8, %c0_9] : memref<1x3x2x128xf32, #tpu.memory_space<vmem>>, vector<1x1x2x128xf32>
    %63 = vector.shape_cast %62 : vector<1x1x2x128xf32> to vector<2x128xf32>
    %64 = vector.shape_cast %61 : vector<2x128xf32> to vector<1x1x2x128xf32>
    tpu.vector_store %arg4[%c0_6, %c0_7, %c0_8, %c0_9], %64 {strides = array<i32>} : memref<1x3x2x128xf32, #tpu.memory_space<vmem>>, vector<1x1x2x128xf32>,
    %65 = arith.mulf %36, %60 : vector<2x128xf32>
    %c0_10 = arith.constant 0 : index
    %c1_11 = arith.constant 1 : index
    %c0_12 = arith.constant 0 : index
    %c0_13 = arith.constant 0 : index
    %66 = vector.load %arg4[%c0_10, %c1_11, %c0_12, %c0_13] : memref<1x3x2x128xf32, #tpu.memory_space<vmem>>, vector<1x1x2x128xf32>
    %67 = vector.shape_cast %66 : vector<1x1x2x128xf32> to vector<2x128xf32>
    %68 = vector.shape_cast %65 : vector<2x128xf32> to vector<1x1x2x128xf32>
    tpu.vector_store %arg4[%c0_10, %c1_11, %c0_12, %c0_13], %68 {strides = array<i32>} : memref<1x3x2x128xf32, #tpu.memory_space<vmem>>, vector<1x1x2x128xf32>,
    %69 = arith.mulf %52, %60 : vector<2x128xf32>
    %c0_14 = arith.constant 0 : index
    %c2 = arith.constant 2 : index
    %c0_15 = arith.constant 0 : index
    %c0_16 = arith.constant 0 : index
    %70 = vector.load %arg4[%c0_14, %c2, %c0_15, %c0_16] : memref<1x3x2x128xf32, #tpu.memory_space<vmem>>, vector<1x1x2x128xf32>
    %71 = vector.shape_cast %70 : vector<1x1x2x128xf32> to vector<2x128xf32>
    %72 = vector.shape_cast %69 : vector<2x128xf32> to vector<1x1x2x128xf32>
    tpu.vector_store %arg4[%c0_14, %c2, %c0_15, %c0_16], %72 {strides = array<i32>} : memref<1x3x2x128xf32, #tpu.memory_space<vmem>>, vector<1x1x2x128xf32>,
    return
  }
  func.func @transform_0(%arg0: i32, %arg1: i32) -> i32 {
    %c0_i32 = arith.constant 0 : i32
    %c0_i32_0 = arith.constant 0 : i32
    return %c0_i32 : i32
  }
  func.func @transform_1(%arg0: i32, %arg1: i32) -> (i32, i32, i32, i32) {
    %c0_i32 = arith.constant 0 : i32
    %c0_i32_0 = arith.constant 0 : i32
    %c0_i32_1 = arith.constant 0 : i32
    return %arg0, %c0_i32, %arg1, %c0_i32_0 : i32, i32, i32, i32
  }
  func.func @transform_2(%arg0: i32, %arg1: i32) -> (i32, i32, i32, i32) {
    %c0_i32 = arith.constant 0 : i32
    %c0_i32_0 = arith.constant 0 : i32
    %c0_i32_1 = arith.constant 0 : i32
    return %arg0, %c0_i32, %arg1, %c0_i32_0 : i32, i32, i32, i32
  }
}

</mosaic_0001>

<bundles_post_ra>
// kernel: tpu_custom_call.1
= control target key start
LH: loop header
LB: loop body
LE: loop exit
PB: predicated region body
PF: predicated region fallthrough
CT: control target
= control target key end

     0   :  { %s773_s0 = inlined_call_operand.hbm [shape: f32[64], index: 0, kind: input, shape index: {}]   ;;  %s774_s1 = inlined_call_operand.hbm [shape: f32[4,2,2,128], index: 1, kind: input, shape index: {}]   ;;  %s775_s2 = inlined_call_operand.hbm [shape: f32[4,3,2,128], index: 2, kind: output, shape index: {}]  }
   0x1   :  { %776 = sst [smem:[#allocation11_spill]] %s773_s0 }
   0x2   :  { %7 = vsyncpa [#allocation5], 0 }
   0x3   :  { %8 = vsyncpa [#allocation3], 0 }
   0x4   :  { %10 = vsyncpa [#allocation3 + $0x1], 0 }
   0x5   :  { %11 = vsyncpa [#allocation4], 0 }
   0x6   :  { %13 = vsyncpa [#allocation4 + $0x1], 0  ;;  %s628_s9 = smov 0   ;;  %s630_s10 = smov 0  }
   0x7   :  { %s632_s11 = smov 0   ;;  %s634_s12 = smov 0  }
   0x8   :  { %s636_s13 = smov 0   ;;  %s638_s14 = smov 0  }
   0x9 LB: > { %s375_s15 = sadd.s32 4294967295, %s606_s14   ;;  %s376_s16 = sadd.s32 4294967294, %s606_s14   ;;  %s606_s14 = sphi %s638_s14, %s19_s14   ;;  %s602_s13 = sphi %s636_s13, %s788_s13   ;;  %s598_s12 = sphi %s634_s12, %s787_s12   ;;  %s594_s11 = sphi %s632_s11, %s786_s11   ;;  %s590_s10 = sphi %s630_s10, %s785_s10   ;;  %s586_s9 = sphi %s628_s9, %s784_s9  }
   0xa   : > { %s61_s17 = sadd.s32 1, %s594_s11  ;;  %p68_p0 = scmp.ne.s32.totalorder %s594_s11, %s590_s10 }
   0xb   : > { %p69_p1 = scmp.eq.s32.totalorder %s606_s14, 0  ;;  %p74_p2 = scmp.ne.s32.totalorder %s590_s10, %s586_s9 }
   0xc   : > { %p666_p3 = scmp.eq.s32.totalorder %s375_s15, 0  ;;  %p100_p4 = scmp.eq.s32.totalorder %s375_s15, 3 }
   0xd   : > { %p70_p5 = por %p69_p1, %p68_p0  ;;  %p106_p6 = scmp.eq.s32.totalorder %s376_s16, 3 }
   0xe   : > { %p672_p7 = por %p666_p3, %p74_p2  ;;  %p676_p8 = por %p100_p4, %p68_p0 }
   0xf   : > { %p680_p9 = por %p106_p6, %p74_p2  ;;  %p377_p10 = scmp.ge.s32.totalorder %s606_s14, 1 }
  0x10   : > { %p113_p11 = scmp.lt.s32.totalorder %s606_s14, 5  ;;  %s781_s0 = sld [smem:[#allocation11_spill]] }
  0x11   : > { %p417_p13 = scmp.lt.s32.totalorder %s606_s14, 4  ;;  %s31_s27 = sadd.s32 1, %s602_s13 }
  0x12   : > { %p689_p12 = pnand %p377_p10, %p113_p11  ;;  %p33_p4 = scmp.ge.s32.totalorder %s31_s27, 4 }
  0x13   : > { %p696_p1 = pnand %p417_p13, %p70_p5  ;;  %s136_s28 = sand.u32 1, %s594_s11  }
  0x14   : > { %p404_p0 = pneg %p689_p12  ;;  %s608_s29 = smov [#allocation2]  }
  0x15   : > { %s790_s27 = smov (%p33_p4, %s31_s27), 0  ;;  %s380_s30 = sshll.u32 %s136_s28, 2 }
  0x16   : > { %s125_s24 = sshll.u32 %s781_s0, 4  ;;  %p405_p2 = pnand %p404_p0, %p666_p3  ;;  %s126_s24 = int_to_ptr.hbm [resolvable:$true] %s125_s24 }
  0x17   : > { %s56_s3 = ssub.s32 %s602_s13, %s790_s27  ;;  %s393_s4 = sshll.u32 %s602_s13, 2 }
  0x18   : > { %407 = dma.hbm_to_smem (!%p405_p2), %s126_s24, 16, %s608_s29, [#allocation5]  }
  0x19   : > { %p59_p6 = scmp.eq.s32.totalorder %s56_s3, 0  ;;  %s146_s7 = scalar_lea.hbm %s774_s1, %s393_s4 }
  0x1a   : > { %s140_s8 = scalar_lea.vmem [#allocation6], %s380_s30  ;;  %s147_s22 = sshll.u32 %s146_s7, 4  ;;  %s148_s22 = int_to_ptr.hbm [resolvable:$true] %s147_s22 }
  0x1b   : > { %s149_s15 = sshll.u32 %s140_s8, 4  ;;  %s137_s23 = scalar_lea.sflag [#allocation3], %s136_s28  ;;  %s150_s15 = int_to_ptr.vmem [resolvable:$true] %s149_s15 }
  0x1c   : > { %s715_s16 = scalar_select %p59_p6, %s594_s11, %s61_s17  }
  0x1d   : > { %s609_s24 = smov 32   ;;  %s610_s29 = smov 2  }
  0x1e   : > { %411 = dma.hbm_to_vmem [thread:$0]  (!%p696_p1), %s148_s22, 64, %s150_s15, %s137_s23, %s609_s24, %s609_s24, %s610_s29  }
  0x1f   : > { %161 = sbr.rel (%p689_p12) target bundleno = 96 (0x60), region = 28 }
  0x24   : > { %573 = dma.done.wait (%p666_p3), [#allocation5], 16  }
  0x25   : > { %575 = vsyncadd (%p666_p3), [#allocation5], 4294967280  ;;  %s726_s17 = sand.u32 1, %s590_s10  }
  0x26   : > { %s385_s28 = sshll.u32 %s726_s17, 2  ;;  %s169_s30 = scalar_lea.sflag [#allocation3], %s726_s17 }
  0x27   : > { %s172_s3 = scalar_lea.vmem [#allocation6], %s385_s28 }
  0x28   : > { %577 = dma.done.wait (%p672_p7), %s169_s30, 64  }
  0x29   : > { %579 = vsyncadd (%p672_p7), %s169_s30, 4294967232 }
  0x2a   : > { %178 = sfence }
  0x2b   : > { %s386_s25 = sshll.u32 %s598_s12, 4  ;;  %v196_v0 = vld [vmem:[%s172_s3] sm:$0x3]  ;;  %v387_v1 = vld [vmem:[%s172_s3 + $0x2] sm:$0x3]  ;;  %s394_s3 = smul.u32 6, %s726_s17 }
  0x2c   : > { %s199_s26 = sld [smem:[#allocation2 + %s386_s25]]  ;;  %s202_s18 = sadd.s32 1, %s386_s25 }
  0x2d   : > { %s203_s4 = sld [smem:[#allocation2 + %s202_s18]]  ;;  %s207_s5 = sadd.s32 2, %s386_s25 }
  0x2e   : > { %s211_s6 = sadd.s32 3, %s386_s25  ;;  %s208_s7 = sld [smem:[#allocation2 + %s207_s5]] }
  0x2f   : > { %s215_s8 = sadd.s32 4, %s386_s25  ;;  %s212_s15 = sld [smem:[#allocation2 + %s211_s6]] }
  0x30   : > { %s220_s22 = sadd.s32 5, %s386_s25  ;;  %s216_s23 = sld [smem:[#allocation2 + %s215_s8]] }
  0x31   : > { %s224_s24 = sadd.s32 6, %s386_s25  ;;  %s221_s29 = sld [smem:[#allocation2 + %s220_s22]] }
  0x32   : > { %v200_v2 = vstv %s199_s26  ;;  %s228_s19 = sadd.s32 7, %s386_s25  ;;  %s225_s28 = sld [smem:[#allocation2 + %s224_s24]] }
  0x33   : > { %v201_v3 = vmul.f32 %v200_v2, %v196_v0  ;;  %v204_v4 = vstv %s203_s4  ;;  %s233_s30 = sadd.s32 8, %s386_s25  ;;  %s229_s0 = sld [smem:[#allocation2 + %s228_s19]] }
  0x34   : > { %v205_v5 = vmul.f32 %v387_v1, %v204_v4  ;;  %v209_v6 = vstv %s208_s7  ;;  %s234_s18 = sld [smem:[#allocation2 + %s233_s30]]  ;;  %s395_s25 = smul.u32 6, %s598_s12 }
  0x35   : > { %v213_v8 = vstv %s212_s15  ;;  %s194_s5 = scalar_lea.vmem [#allocation7], %s394_s3  ;;  %s262_s12 = scalar_lea.sflag [#allocation4], %s726_s17 }
  0x36   : > { %v206_v7 = vadd.f32 %v205_v5, %v201_v3  ;;  %v214_v9 = vmul.f32 %v213_v8, %v196_v0  ;;  %v217_v10 = vstv %s216_s23  ;;  %s274_s4 = scalar_lea.hbm %s775_s2, %s395_s25  ;;  %s275_s6 = sshll.u32 %s194_s5, 4  ;;  %s276_s6 = int_to_ptr.vmem [resolvable:$true] %s275_s6 }
  0x37   : > { %v218_v12 = vmul.f32 %v387_v1, %v217_v10  ;;  %v222_v13 = vstv %s221_s29  ;;  %s277_s7 = sshll.u32 %s274_s4, 4  ;;  %s540_s24 = scalar_lea.hbm %s775_s2, 24  ;;  %s278_s7 = int_to_ptr.hbm [resolvable:$true] %s277_s7 }
  0x38   : > { %v210_v11 = vadd.f32 %v209_v6, %v206_v7  ;;  %v226_v14 = vstv %s225_s28  ;;  %s534_s8 = sshra.s32 %s278_s7, 4  ;;  %s535_s8 = int_to_ptr.hbm [resolvable:$true] %s534_s8 }
  0x39   : > { %v219_v15 = vadd.f32 %v218_v12, %v214_v9  ;;  %v227_v16 = vmul.f32 %v226_v14, %v196_v0  ;;  %v230_v17 = vstv %s229_s0  ;;  %s536_s15 = scalar_lea.hbm %s535_s8, 6  ;;  %p541_p10 = scmp.lt.s32.totalorder %s535_s8, %s775_s2 }
  0x3a   : > { %v231_v18 = vmul.f32 %v387_v1, %v230_v17  ;;  %v235_v20 = vstv %s234_s18  ;;  %v237_v21 = vmul.f32 %v210_v11, %v210_v11  ;;  %p537_p3 = scmp.ne.s32.totalorder %s535_s8, %s536_s15  ;;  %p542_p11 = scmp.lt.s32.totalorder %s540_s24, %s536_s15 }
  0x3b   : > { %v223_v19 = vadd.f32 %v222_v13, %v219_v15 }
  0x3c   : > { %v232_v22 = vadd.f32 %v231_v18, %v227_v16  ;;  %p538_p5 = pnand %p537_p3, %p676_p8  ;;  %p543_p12 = por %p542_p11, %p541_p10 }
  0x3d   : > { %v238_v23 = vmul.f32 %v223_v19, %v223_v19 }
  0x3e   : > { %v236_v24 = vadd.f32 %v235_v20, %v232_v22  ;;  %p539_p7 = pneg %p538_p5 }
  0x3f   : > { %v239_v25 = vadd.f32 %v238_v23, %v237_v21 }
  0x40   : > { %v240_v26 = vmul.f32 %v236_v24, %v236_v24  ;;  %p544_p13 = pnand %p543_p12, %p539_p7 }
  0x42   : > { %v241_v27 = vadd.f32 %v240_v26, %v239_v25 }
  0x44   : > { %v242_v28 = vmax.f32 %v241_v27, 1e-24 }
  0x46   : > { %473 = vrsqrt.f32 %v242_v28  ;;  %vm249_vm0 = vweird.f32 %v242_v28 }
  0x4c   : > { %v474_v29 = vpop.eup %473 }
  0x4d   : > { %v244_v30 = vmul.f32 %v474_v29, %v242_v28  ;;  %vm250_vm1 = vweird.f32 %v474_v29 }
  0x4e   : > { %vm251_vm2 = vmor %vm249_vm0, %vm250_vm1 }
  0x4f   : > { %v245_v31 = vmul.f32 %v474_v29, %v244_v30 }
  0x51   : > { %v246_v32 = vmul.f32 0.5, %v245_v31 }
  0x53   : > { %v247_v33 = vsub.f32 1.5, %v246_v32 }
  0x55   : > { %v248_v34 = vmul.f32 %v474_v29, %v247_v33 }
  0x57   : > { %v252_v35 = vsel %vm251_vm2, %v474_v29, %v248_v34 }
  0x58   : > { %v253_v36 = vmul.f32 %v252_v35, %v210_v11  ;;  %v255_v37 = vmul.f32 %v252_v35, %v223_v19  ;;  %v258_v38 = vmul.f32 %v252_v35, %v236_v24 }
  0x5a   : > { %254 = vst [vmem:[%s194_s5] sm:$0x3] %v253_v36 }
  0x5b   : > { %388 = vst [vmem:[%s194_s5 + $0x2] sm:$0x3] %v255_v37 }
  0x5c   : > { %389 = vst [vmem:[%s194_s5 + $0x4] sm:$0x3] %v258_v38 }
  0x5d   : > { %547 = shalt.err (!%p544_p13)
}
  0x5e   : > { %s611_s17 = smov 32   ;;  %s612_s28 = smov 2  }
  0x5f   : > { %402 = dma.vmem_to_hbm [thread:$0]  (%p676_p8), %s276_s6, 96, %s278_s7, %s262_s12, %s611_s17, %s611_s17, %s612_s28  }
  0x60 PF: > { %p419_p0 = scmp.ge.s32.totalorder %s606_s14, 2  ;;  %s292_s30 = sand.u32 1, %s586_s9  }
  0x61   : > { %s293_s18 = scalar_lea.sflag [#allocation4], %s292_s30 }
  0x62   : > { %p413_p1 = pnand %p419_p0, %p680_p9 }
  0x64   : > { %p414_p2 = pneg %p413_p1 }
  0x66   : > { %581 = dma.done.wait (%p414_p2), %s293_s18, 96  }
  0x67   : > { %583 = vsyncadd (%p414_p2), %s293_s18, 4294967200  ;;  %s19_s14 = sadd.s32 1, %s606_s14   ;;  %s784_s9 = smov %s590_s10 }
  0x68   : > { %p16_p4 = scmp.ge.s32.totalorder %s19_s14, 6   ;;  %s785_s10 = smov %s594_s11 }
  0x69   : > { %s786_s11 = smov %s715_s16  ;;  %s787_s12 = smov %s602_s13 }
  0x6a   : > { %s788_s13 = smov %s790_s27  ;;  %18 = sbr.rel (!%p16_p4) target bundleno = 9 (0x9), region = 81 }
  0x6f   :  { %299 = vsyncpa [#allocation3], 1 }
  0x70   :  { %301 = vsyncpa [#allocation3 + $0x1], 1 }
  0x71   :  { %302 = vsyncpa [#allocation4], 1 }
  0x72   :  { %304 = vsyncpa [#allocation4 + $0x1], 1 }
  0x73   :  { %305 = vsyncpa [#allocation5], 1 }
  0x74   :  { %307 = vsyncpa [#allocation5 + $0x1], 1 }

</bundles_post_ra>
